<compile_context>
chip_gen: v5e
topology: v5e:2x2
jax: 0.10.0
libtpu: 0.0.40
codegen_flags: <defaults>
</compile_context>

<pallas_src>
import jax
import jax.numpy as jnp
import numpy as np
from jax import lax
from jax.experimental import pallas as pl
from jax.experimental.pallas import tpu as pltpu

BIT = 4  # config['bit']


# ------------------------------- tiling helper ------------------------------
def _pick_tile(total, target, align):
    """Largest t <= target with t % align == 0 and total % t == 0.
    If total <= target, use the full extent (always legal for BlockSpec)."""
    if total <= target:
        return total
    assert total % align == 0, (total, align)
    best = align
    t = align
    while t <= target:
        if total % t == 0:
            best = t
        t += align
    return best


# --------------------------- kernel 1: weight quant --------------------------
def _weight_quant_kernel(wparams_ref, w_ref, wq_ref):
    # wparams_ref: SMEM (3, 4): [w_lb, w_ub, w_s, 1/w_s] per branch
    j = pl.program_id(0)
    w_lb = wparams_ref[j, 0]
    w_ub = wparams_ref[j, 1]
    w_s = wparams_ref[j, 2]
    w_inv_s = wparams_ref[j, 3]

    w = w_ref[0]                                   # (tr, D) f32
    wc = jnp.clip(w, w_lb, w_ub)
    wq = jnp.round((wc - w_lb) * w_inv_s) * w_s + w_lb
    wq_ref[0] = wq.astype(wq_ref.dtype)            # store bf16 MXU operand


def quantize_weights(W, wparams, *, mxu_dtype=jnp.bfloat16, tr_target=256):
    """W: (3, D_out, D_in) f32 -> (3*D_out, D_in) fake-quantized, mxu_dtype."""
    _, Dout, Din = W.shape
    tr = _pick_tile(Dout, tr_target, 8)
    grid_spec = pltpu.PrefetchScalarGridSpec(
        num_scalar_prefetch=1,                     # wparams -> SMEM
        grid=(3, Dout // tr),
        in_specs=[pl.BlockSpec((1, tr, Din), lambda j, r, p: (j, r, 0))],
        out_specs=pl.BlockSpec((1, tr, Din), lambda j, r, p: (j, r, 0)),
    )
    wq = pl.pallas_call(
        _weight_quant_kernel,
        out_shape=jax.ShapeDtypeStruct((3, Dout, Din), mxu_dtype),
        grid_spec=grid_spec,
        compiler_params=pltpu.CompilerParams(
            dimension_semantics=("parallel", "parallel")),
    )(wparams, W)
    # rows = [Wq; Wk; Wv]  -> exactly the F.linear weight of cat([q,k,v], -1)
    return wq.reshape(3 * Dout, Din)


# -------------------------- kernel 2: fused QKV GEMM --------------------------
def _qkv_matmul_kernel(aparams_ref, x_ref, wq_ref, b_ref, o_ref, xq_scratch):
    # aparams_ref: SMEM (4,): [a_lb, a_ub, a_s, 1/a_s] (shared by q/k/v)
    a_lb = aparams_ref[0]
    a_ub = aparams_ref[1]
    a_s = aparams_ref[2]
    a_inv_s = aparams_ref[3]

    # Activation fake-quant hoisted: compute once per row tile.  The n axis is
    # "arbitrary" (sequential per core), so n == 0 is always executed before
    # any other n for a given row tile, even with the M axis megacore-sharded.
    @pl.when(pl.program_id(1) == 0)
    def _():
        x = x_ref[...]                                           # (tm, D) f32
        xc = jnp.clip(x, a_lb, a_ub)
        xq = jnp.round((xc - a_lb) * a_inv_s) * a_s + a_lb
        xq_scratch[...] = xq.astype(xq_scratch.dtype)            # bf16

    # (tm, D) @ (tn, D)^T via dot_general dimension numbers (no explicit
    # transpose / XLU work); f32 accumulation on the MXU.
    y = lax.dot_general(
        xq_scratch[...], wq_ref[...],
        dimension_numbers=(((1,), (1,)), ((), ())),
        preferred_element_type=jnp.float32)
    o_ref[...] = (y + b_ref[...]).astype(o_ref.dtype)


def quant_linear_qkv(x, Wq, Wk, Wv, bq, bk, bv, aparams, wparams, *,
                     tm=256, tn=512, mxu_dtype=jnp.bfloat16):
    """x: (..., D) f32. Returns (..., 3*D) == torch.cat([q, k, v], dim=-1)."""
    D = x.shape[-1]
    lead = x.shape[:-1]
    x2d = x.reshape(-1, D).astype(jnp.float32)
    M = x2d.shape[0]
    N = 3 * D

    # One-shot per-branch weight fake-quant -> (3D, D) bf16.
    W = jnp.stack([Wq, Wk, Wv], axis=0).astype(jnp.float32)
    Wq_cat = quantize_weights(W, wparams, mxu_dtype=mxu_dtype)
    b_cat = jnp.concatenate([bq, bk, bv]).astype(jnp.float32).reshape(1, N)

    tm = _pick_tile(M, tm, 8)
    tn = _pick_tile(N, tn, 128)

    grid_spec = pltpu.PrefetchScalarGridSpec(
        num_scalar_prefetch=1,                              # aparams -> SMEM
        grid=(M // tm, N // tn),
        in_specs=[
            pl.BlockSpec((tm, D), lambda i, n, p: (i, 0)),  # x row tile (reused over n)
            pl.BlockSpec((tn, D), lambda i, n, p: (n, 0)),  # quantized weight rows
            pl.BlockSpec((1, tn), lambda i, n, p: (0, n)),  # bias slice
        ],
        out_specs=pl.BlockSpec((tm, tn), lambda i, n, p: (i, n)),
        scratch_shapes=[pltpu.VMEM((tm, D), mxu_dtype)],    # hoisted xq
    )
    out = pl.pallas_call(
        _qkv_matmul_kernel,
        out_shape=jax.ShapeDtypeStruct((M, N), jnp.float32),
        grid_spec=grid_spec,
        compiler_params=pltpu.CompilerParams(
            # M tiles shard across TensorCores (v7x); n stays sequential so the
            # pl.when(n == 0) activation-quant hoist is always valid.
            dimension_semantics=("parallel", "arbitrary")),
    )(aparams, x2d, Wq_cat, b_cat)

    return out.reshape(*lead, N)


# ------------------------- plain-JAX glue (calibration) ----------------------
def _fake_quant(t, lb, ub, s):
    c = jnp.clip(t, lb, ub)
    return jnp.round((c - lb) / s) * s + lb


def dobi_calibrate(t, bit=BIT, num=100):
    """Replicates DOBI(one_direction=False): symmetric shrink search."""
    t = t.astype(jnp.float32)
    mn, mx = jnp.min(t), jnp.max(t)
    diff = (mx - mn) / (2 * num)
    idx = jnp.arange(num, dtype=jnp.float32)
    lbs = mn + diff * idx
    ubs = mx - diff * idx

    def mse(lb, ub):
        s = (ub - lb) / (2.0 ** bit - 1.0)
        return jnp.linalg.norm(t - _fake_quant(t, lb, ub, s))

    errs = jax.vmap(mse)(lbs, ubs)
    b = jnp.argmin(errs)                 # first minimum, same tie-break as torch loop
    lb, ub = lbs[b], ubs[b]
    s = (ub - lb) / (2.0 ** bit - 1.0)   # int_quant=True -> round(n_bit) == bit
    return lb, ub, s


def build_quant_params(x, weights, bit=BIT):
    """aparams (4,) = [a_lb, a_ub, a_s, 1/a_s]; wparams (3, 4) analogous per branch.

    The three act quantizers are all calibrated on the same x (and load_values
    sets identical bounds for q/k/v), so a single shared set is faithful."""
    a_lb, a_ub, a_s = dobi_calibrate(x, bit)
    aparams = jnp.stack(
        [a_lb, a_ub, a_s, 1.0 / jnp.maximum(a_s, 1e-12)]).astype(jnp.float32)
    rows = []
    for W in weights:
        w_lb, w_ub, w_s = dobi_calibrate(W, bit)
        rows.append(jnp.stack([w_lb, w_ub, w_s, 1.0 / jnp.maximum(w_s, 1e-12)]))
    return aparams, jnp.stack(rows, axis=0).astype(jnp.float32)


def reference_forward(x, Ws, Bs, aparams, wparams):
    """Pure-f32 reference matching the calibrated torch forward."""
    D = x.shape[-1]
    x2d = x.reshape(-1, D).astype(jnp.float32)
    xq = _fake_quant(x2d, aparams[0], aparams[1], aparams[2])
    outs = []
    for j in range(3):
        wq = _fake_quant(Ws[j], wparams[j, 0], wparams[j, 1], wparams[j, 2])
        outs.append(xq @ wq.T + Bs[j])
    return jnp.concatenate(outs, axis=-1).reshape(*x.shape[:-1], 3 * D)


# TODO(synk): the uncalibrated first pass (DOBI side-effect calibration),
# running_stat / dynamic / bit2bound quantizer modes and in-place Parameter
# mutation have no in-kernel equivalent; only the steady-state calibrated
# forward path is implemented.

if __name__ == "__main__":
    key = jax.random.PRNGKey(0)
    B, S, D = 2, 256, 128                    # M = 512 rows, feature dim 128
    k_x, k_wq, k_wk, k_wv, k_bq, k_bk, k_bv = jax.random.split(key, 7)

    x = jax.random.normal(k_x, (B, S, D), dtype=jnp.float32)
    Wq = 0.1 * jax.random.normal(k_wq, (D, D), dtype=jnp.float32)
    Wk = 0.1 * jax.random.normal(k_wk, (D, D), dtype=jnp.float32)
    Wv = 0.1 * jax.random.normal(k_wv, (D, D), dtype=jnp.float32)
    bq = 0.05 * jax.random.normal(k_bq, (D,), dtype=jnp.float32)
    bk = 0.05 * jax.random.normal(k_bk, (D,), dtype=jnp.float32)
    bv = 0.05 * jax.random.normal(k_bv, (D,), dtype=jnp.float32)

    aparams, wparams = build_quant_params(x, (Wq, Wk, Wv))

    # tn=128 exercises the multi-step inner (column) axis and the hoisted
    # activation-quant reuse; production callers keep the wider defaults.
    out = quant_linear_qkv(x, Wq, Wk, Wv, bq, bk, bv, aparams, wparams,
                           tm=256, tn=128)
    out = jax.block_until_ready(out)

    ref = reference_forward(x, (Wq, Wk, Wv), (bq, bk, bv), aparams, wparams)
    assert out.shape == (B, S, 3 * D)
    # bf16 MXU operands (f32 accumulate) vs pure-f32 reference: errors are far
    # below the 4-bit fake-quant step, well inside these tolerances.
    np.testing.assert_allclose(np.asarray(out), np.asarray(ref), atol=3e-2, rtol=3e-2)

    print("KERNEL_OK")
</pallas_src>

<mosaic_0001>
module attributes {stable_mosaic.version = 11 : i64} {
  func.func @_weight_quant_kernel(%arg0: i32, %arg1: i32, %arg2: memref<3x4xf32, #tpu.memory_space<smem>>, %arg3: memref<1x128x128xf32, #tpu.memory_space<vmem>>, %arg4: memref<1x128x128xbf16, #tpu.memory_space<vmem>>) attributes {dimension_semantics = [#tpu.dimension_semantics<parallel>, #tpu.dimension_semantics<parallel>], iteration_bounds = array<i64: 3, 1>, scalar_prefetch = 1 : i64, scratch_operands = 0 : i64, tpu.core_type = #tpu.core_type<tc>, window_params = [{transform_indices = @transform_0, window_bounds = array<i64: 1, 128, 128>}, {transform_indices = @transform_1, window_bounds = array<i64: 1, 128, 128>}]} {
    %0 = arith.index_cast %arg0 : i32 to index
    %c0 = arith.constant 0 : index
    %1 = memref.load %arg2[%0, %c0] : memref<3x4xf32, #tpu.memory_space<smem>>
    %2 = arith.index_cast %arg0 : i32 to index
    %c1 = arith.constant 1 : index
    %3 = memref.load %arg2[%2, %c1] : memref<3x4xf32, #tpu.memory_space<smem>>
    %4 = arith.index_cast %arg0 : i32 to index
    %c2 = arith.constant 2 : index
    %5 = memref.load %arg2[%4, %c2] : memref<3x4xf32, #tpu.memory_space<smem>>
    %6 = arith.index_cast %arg0 : i32 to index
    %c3 = arith.constant 3 : index
    %7 = memref.load %arg2[%6, %c3] : memref<3x4xf32, #tpu.memory_space<smem>>
    %c0_0 = arith.constant 0 : index
    %c0_1 = arith.constant 0 : index
    %c0_2 = arith.constant 0 : index
    %8 = vector.load %arg3[%c0_0, %c0_1, %c0_2] : memref<1x128x128xf32, #tpu.memory_space<vmem>>, vector<1x128x128xf32>
    %9 = vector.shape_cast %8 : vector<1x128x128xf32> to vector<128x128xf32>
    %10 = vector.broadcast %1 : f32 to vector<128x128xf32>
    %11 = arith.maximumf %10, %9 : vector<128x128xf32>
    %12 = vector.broadcast %3 : f32 to vector<128x128xf32>
    %13 = arith.minimumf %12, %11 : vector<128x128xf32>
    %14 = vector.broadcast %1 : f32 to vector<128x128xf32>
    %15 = arith.subf %13, %14 : vector<128x128xf32>
    %16 = vector.broadcast %7 : f32 to vector<128x128xf32>
    %17 = arith.mulf %15, %16 : vector<128x128xf32>
    %18 = math.roundeven %17 : vector<128x128xf32>
    %19 = vector.broadcast %5 : f32 to vector<128x128xf32>
    %20 = arith.mulf %18, %19 : vector<128x128xf32>
    %21 = vector.broadcast %1 : f32 to vector<128x128xf32>
    %22 = arith.addf %20, %21 : vector<128x128xf32>
    %23 = arith.truncf %22 : vector<128x128xf32> to vector<128x128xbf16>
    %c0_3 = arith.constant 0 : index
    %c0_4 = arith.constant 0 : index
    %c0_5 = arith.constant 0 : index
    %24 = vector.load %arg4[%c0_3, %c0_4, %c0_5] : memref<1x128x128xbf16, #tpu.memory_space<vmem>>, vector<1x128x128xbf16>
    %25 = vector.shape_cast %24 : vector<1x128x128xbf16> to vector<128x128xbf16>
    %26 = vector.shape_cast %23 : vector<128x128xbf16> to vector<1x128x128xbf16>
    tpu.vector_store %arg4[%c0_3, %c0_4, %c0_5], %26 {strides = array<i32>} : memref<1x128x128xbf16, #tpu.memory_space<vmem>>, vector<1x128x128xbf16>,
    return
  }
  func.func @transform_0(%arg0: i32, %arg1: i32, %arg2: memref<3x4xf32, #tpu.memory_space<smem>>) -> (i32, i32, i32) {
    %c0_i32 = arith.constant 0 : i32
    %c0_i32_0 = arith.constant 0 : i32
    return %arg0, %arg1, %c0_i32 : i32, i32, i32
  }
  func.func @transform_1(%arg0: i32, %arg1: i32, %arg2: memref<3x4xf32, #tpu.memory_space<smem>>) -> (i32, i32, i32) {
    %c0_i32 = arith.constant 0 : i32
    %c0_i32_0 = arith.constant 0 : i32
    return %arg0, %arg1, %c0_i32 : i32, i32, i32
  }
}

</mosaic_0001>

<bundles_post_ra>
// kernel: tpu_custom_call.1
= control target key start
LH: loop header
LB: loop body
LE: loop exit
PB: predicated region body
PF: predicated region fallthrough
CT: control target
= control target key end

     0   :  { %s831_s12 = smov [#allocation3]   ;;  %s1194_s0 = inlined_call_operand.hbm [shape: f32[3,4], index: 0, kind: input, shape index: {}]   ;;  %s1195_s1 = inlined_call_operand.hbm [shape: f32[3,128,128], index: 1, kind: input, shape index: {}]   ;;  %s1196_s2 = inlined_call_operand.hbm [shape: bf16[3,128,128], index: 2, kind: output, shape index: {}]  }
   0x1   :  { %s8_s11 = sshll.u32 %s1194_s0, 4  ;;  %s9_s11 = int_to_ptr.hbm [resolvable:$true] %s8_s11 }
   0x2   :  { %11 = dma.hbm_to_smem %s9_s11, 64, %s831_s12, [#allocation2] }
   0x3   :  { %797 = dma.done.wait [#allocation2], 64 }
   0x4   :  { %798 = vsyncadd [#allocation2], 4294967232 }
   0x5   :  { %14 = sfence }
   0x6   :  { %15 = vsyncpa [#allocation5], 0 }
   0x7   :  { %17 = vsyncpa [#allocation5 + $0x1], 0 }
   0x8   :  { %18 = vsyncpa [#allocation6], 0 }
   0x9   :  { %20 = vsyncpa [#allocation6 + $0x1], 0  ;;  %s854_s13 = smov 0   ;;  %s856_s14 = smov 0  }
   0xa   :  { %s858_s15 = smov 0   ;;  %s860_s16 = smov 0  }
   0xb   :  { %s862_s17 = smov 0   ;;  %s864_s0 = smov 0  }
   0xc LB: > { %s443_s18 = sadd.s32 4294967295, %s829_s0   ;;  %s444_s19 = sadd.s32 4294967294, %s829_s0   ;;  %s829_s0 = sphi %s864_s0, %s26_s0   ;;  %s825_s17 = sphi %s862_s17, %s1229_s17   ;;  %s821_s16 = sphi %s860_s16, %s1228_s16   ;;  %s817_s15 = sphi %s858_s15, %s1227_s15   ;;  %s813_s14 = sphi %s856_s14, %s1226_s14   ;;  %s809_s13 = sphi %s854_s13, %s1225_s13  }
   0xd   : > { %s38_s20 = sadd.s32 1, %s825_s17  ;;  %s47_s21 = sadd.s32 1, %s817_s15 }
   0xe   : > { %p40_p0 = scmp.ge.s32.totalorder %s38_s20, 3  ;;  %p54_p1 = scmp.ne.s32.totalorder %s817_s15, %s813_s14 }
   0xf   : > { %p55_p2 = scmp.eq.s32.totalorder %s829_s0, 0  ;;  %p60_p3 = scmp.ne.s32.totalorder %s813_s14, %s809_s13 }
  0x10   : > { %s1231_s20 = smov (%p40_p0, %s38_s20), 0  ;;  %p61_p5 = scmp.eq.s32.totalorder %s443_s18, 0 }
  0x11   : > { %p895_p4 = por %p55_p2, %p54_p1  ;;  %s42_s23 = ssub.s32 %s825_s17, %s1231_s20 }
  0x12   : > { %p86_p6 = scmp.eq.s32.totalorder %s443_s18, 2  ;;  %p45_p7 = scmp.eq.s32.totalorder %s42_s23, 0 }
  0x13   : > { %p901_p8 = por %p61_p5, %p60_p3  ;;  %p92_p10 = scmp.eq.s32.totalorder %s444_s19, 2 }
  0x14   : > { %p905_p9 = por %p86_p6, %p54_p1  ;;  %p648_p12 = scmp.lt.s32.totalorder %s829_s0, 3 }
  0x15   : > { %s910_s26 = scalar_select %p45_p7, %s817_s15, %s47_s21  }
  0x16   : > { %p912_p11 = por %p92_p10, %p60_p3  ;;  %s112_s28 = sand.u32 1, %s817_s15  }
  0x17   : > { %s447_s29 = sshll.u32 %s112_s28, 7  ;;  %s459_s30 = sshll.u32 %s825_s17, 7 }
  0x18   : > { %s123_s5 = scalar_lea.hbm %s1195_s1, %s459_s30  ;;  %s116_s6 = scalar_lea.vmem [#allocation4], %s447_s29 }
  0x19   : > { %s126_s7 = sshll.u32 %s116_s6, 4  ;;  %s124_s8 = sshll.u32 %s123_s5, 4  ;;  %s127_s7 = int_to_ptr.vmem [resolvable:$true] %s126_s7  ;;  %s125_s8 = int_to_ptr.hbm [resolvable:$true] %s124_s8 }
  0x1a   : > { %p641_p13 = pnand %p648_p12, %p895_p4  ;;  %p450_p0 = scmp.ge.s32.totalorder %s829_s0, 1 }
  0x1b   : > { %s113_s9 = scalar_lea.sflag [#allocation5], %s112_s28  ;;  %s832_s10 = smov 128  }
  0x1c   : > { %s833_s11 = smov 8   ;;  %p134_p1 = scmp.lt.s32.totalorder %s829_s0, 4 }
  0x1d   : > { %643 = dma.hbm_to_vmem [thread:$0]  (!%p641_p13), %s125_s8, 2048, %s127_s7, %s113_s9, %s832_s10, %s832_s10, %s833_s11  }
  0x1e   : > { %p135_p2 = pnand %p450_p0, %p134_p1 }
  0x1f   : > { %s927_s12 = sand.u32 (!%p135_p2), 1, %s813_s14  }
  0x20   : > { %138 = sbr.rel (%p135_p2) target bundleno = 119 (0x77), region = 24  ;;  %s451_s18 = sshll.u32 (!%p135_p2), %s927_s12, 7 }
  0x21   : > { %s141_s19 = scalar_lea.sflag (!%p135_p2), [#allocation5], %s927_s12  ;;  %s931_s21 = scalar_lea.vmem (!%p135_p2), [#allocation4], %s451_s18 }
  0x25   : > { %800 = dma.done.wait (%p901_p8), %s141_s19, 2048  }
  0x26   : > { %802 = vsyncadd (%p901_p8), %s141_s19, 4294965248  ;;  %s453_s22 = sshll.u32 %s821_s16, 7  ;;  %v174_v0 = vld [vmem:[%s931_s21] sm:$0xff]  ;;  %v175_v1 = vld [vmem:[%s931_s21 + $0x8] sm:$0xff]  ;;  %s452_s24 = sshll.u32 %s927_s12, 6 }
  0x27   : > { %s167_s23 = sld [smem:[#allocation3 + %s453_s22]]  ;;  %s168_s28 = sadd.s32 1, %s453_s22  ;;  %v176_v3 = vld [vmem:[%s931_s21 + $0x10] sm:$0xff]  ;;  %v177_v6 = vld [vmem:[%s931_s21 + $0x18] sm:$0xff]  ;;  %v178_v8 = vld [vmem:[%s931_s21 + $0x20] sm:$0xff] }
  0x28   : > { %s170_s29 = sadd.s32 2, %s453_s22  ;;  %s169_s30 = sld [smem:[#allocation3 + %s168_s28]]  ;;  %v179_v9 = vld [vmem:[%s931_s21 + $0x28] sm:$0xff]  ;;  %v180_v14 = vld [vmem:[%s931_s21 + $0x30] sm:$0xff]  ;;  %v181_v19 = vld [vmem:[%s931_s21 + $0x38] sm:$0xff] }
  0x29   : > { %s172_s3 = sadd.s32 3, %s453_s22  ;;  %s171_s4 = sld [smem:[#allocation3 + %s170_s29]]  ;;  %v184_v50 = vld [vmem:[%s931_s21 + $0x50] sm:$0xff] }
  0x2a   : > { %s173_s5 = sld [smem:[#allocation3 + %s172_s3]]  ;;  %s1046_s6 = scalar_lea.vmem [#allocation7], %s452_s24 }
  0x2b   : > { %s460_s7 = sshll.u32 %s821_s16, 6  ;;  %s353_s11 = sshll.u32 %s1046_s6, 4  ;;  %s354_s11 = int_to_ptr.vmem [resolvable:$true] %s353_s11 }
  0x2c   : > { %s352_s10 = scalar_lea.hbm %s1196_s2, %s460_s7  ;;  %s339_s18 = scalar_lea.sflag [#allocation6], %s927_s12 }
  0x2d   : > { %v940_v2 = vstv %s167_s23  ;;  %s355_s16 = sshll.u32 %s352_s10, 4  ;;  %s765_s28 = scalar_lea.hbm %s1196_s2, 192  ;;  %s356_s16 = int_to_ptr.hbm [resolvable:$true] %s355_s16 }
  0x2e   : > { %v191_v4 = vmax.f32 %v940_v2, %v174_v0  ;;  %v192_v5 = vmax.f32 %v940_v2, %v175_v1  ;;  %v193_v7 = vmax.f32 %v940_v2, %v176_v3  ;;  %v949_v10 = vstv %s169_s30  ;;  %s759_s19 = sshra.s32 %s356_s16, 4  ;;  %s760_s19 = int_to_ptr.hbm [resolvable:$true] %s759_s19 }
  0x2f   : > { %v194_v11 = vmax.f32 %v940_v2, %v177_v6  ;;  %v195_v12 = vmax.f32 %v940_v2, %v178_v8  ;;  %v196_v13 = vmax.f32 %v940_v2, %v179_v9  ;;  %v957_v17 = vstv %s171_s4  ;;  %p766_p6 = scmp.lt.s32.totalorder %s760_s19, %s1196_s2 }
  0x30   : > { %v208_v15 = vmin.f32 %v949_v10, %v191_v4  ;;  %v209_v16 = vmin.f32 %v949_v10, %v192_v5  ;;  %v210_v18 = vmin.f32 %v949_v10, %v193_v7  ;;  %v961_v20 = vstv %s173_s5 }
  0x31   : > { %v211_v21 = vmin.f32 %v949_v10, %v194_v11  ;;  %v212_v22 = vmin.f32 %v949_v10, %v195_v12  ;;  %v213_v23 = vmin.f32 %v949_v10, %v196_v13  ;;  %v197_v27 = vmax.f32 %v940_v2, %v180_v14 }
  0x32   : > { %v224_v24 = vsub.f32 %v208_v15, %v940_v2  ;;  %v225_v25 = vsub.f32 %v209_v16, %v940_v2  ;;  %v226_v26 = vsub.f32 %v210_v18, %v940_v2  ;;  %v198_v31 = vmax.f32 %v940_v2, %v181_v19 }
  0x33   : > { %v227_v28 = vsub.f32 %v211_v21, %v940_v2  ;;  %v228_v29 = vsub.f32 %v212_v22, %v940_v2  ;;  %v229_v30 = vsub.f32 %v213_v23, %v940_v2  ;;  %v978_v35 = vmin.f32 %v949_v10, %v197_v27 }
  0x34   : > { %v241_v32 = vmul.f32 %v961_v20, %v224_v24  ;;  %v242_v33 = vmul.f32 %v961_v20, %v225_v25  ;;  %v243_v34 = vmul.f32 %v961_v20, %v226_v26  ;;  %v215_v39 = vmin.f32 %v949_v10, %v198_v31 }
  0x35   : > { %v244_v36 = vmul.f32 %v961_v20, %v227_v28  ;;  %v982_v37 = vmul.f32 %v961_v20, %v228_v29  ;;  %v985_v38 = vmul.f32 %v961_v20, %v229_v30  ;;  %v230_v27 = vsub.f32 %v978_v35, %v940_v2  ;;  %v182_v28 = vld [vmem:[%s931_s21 + $0x40] sm:$0xff] }
  0x36   : > { %v508_v40 = vand.u32 2147483647, %v241_v32  ;;  %v510_v41 = vcvt.f32.s32 %v241_v32  ;;  %v513_v42 = vand.u32 2147483648, %v241_v32  ;;  %v516_v43 = vand.u32 2147483647, %v242_v33 }
  0x37   : > { %v518_v44 = vcvt.f32.s32 %v242_v33  ;;  %v521_v45 = vand.u32 2147483648, %v242_v33  ;;  %v524_v46 = vand.u32 2147483647, %v243_v34  ;;  %v526_v47 = vcvt.f32.s32 %v243_v34 }
  0x38   : > { %vm988_vm0 = vcmp.lt.f32.partialorder %v508_v40, 8388608.0  ;;  %v511_v49 = vcvt.s32.f32 %v510_v41  ;;  %vm992_vm1 = vcmp.lt.f32.partialorder %v516_v43, 8388608.0  ;;  %v529_v51 = vand.u32 2147483648, %v243_v34 }
  0x39   : > { %v519_v52 = vcvt.s32.f32 %v518_v44  ;;  %vm996_vm2 = vcmp.lt.f32.partialorder %v524_v46, 8388608.0  ;;  %v527_v54 = vcvt.s32.f32 %v526_v47  ;;  %v532_v55 = vand.u32 2147483647, %v244_v36 }
  0x3a   : > { %v512_v56 = vand.u32 2147483647, %v511_v49  ;;  %v534_v57 = vcvt.f32.s32 %v244_v36  ;;  %v537_v58 = vand.u32 2147483648, %v244_v36  ;;  %v540_v59 = vand.u32 2147483647, %v982_v37  ;;  %v183_v49 = vld [vmem:[%s931_s21 + $0x48] sm:$0xff] }
  0x3b   : > { %v520_v60 = vand.u32 2147483647, %v519_v52  ;;  %v528_v61 = vand.u32 2147483647, %v527_v54  ;;  %vm1001_vm3 = vcmp.lt.f32.partialorder %v532_v55, 8388608.0  ;;  %v542_v63 = vcvt.f32.s32 %v982_v37  ;;  %v185_v55 = vld [vmem:[%s931_s21 + $0x58] sm:$0xff] }
  0x3c   : > { %v514_v0 = vor.u32 %v513_v42, %v512_v56  ;;  %v535_v1 = vcvt.s32.f32 %v534_v57  ;;  %vm1006_vm4 = vcmp.lt.f32.partialorder %v540_v59, 8388608.0  ;;  %v545_v4 = vand.u32 2147483648, %v982_v37 }
  0x3d   : > { %v522_v5 = vor.u32 %v521_v45, %v520_v60  ;;  %v530_v6 = vor.u32 %v529_v51, %v528_v61  ;;  %v543_v7 = vcvt.s32.f32 %v542_v63  ;;  %v548_v8 = vand.u32 2147483647, %v985_v38  ;;  %v186_v63 = vld [vmem:[%s931_s21 + $0x60] sm:$0xff] }
  0x3e   : > { %v515_v9 = vsel %vm988_vm0, %v514_v0, %v241_v32  ;;  %v536_v11 = vand.u32 2147483647, %v535_v1  ;;  %v550_v12 = vcvt.f32.s32 %v985_v38  ;;  %v553_v13 = vand.u32 2147483648, %v985_v38 }
  0x3f   : > { %v523_v14 = vsel %vm992_vm1, %v522_v5, %v242_v33  ;;  %v274_v15 = vmul.f32 %v515_v9, %v957_v17  ;;  %v531_v16 = vsel %vm996_vm2, %v530_v6, %v243_v34  ;;  %v544_v18 = vand.u32 2147483647, %v543_v7  ;;  %v187_v9 = vld [vmem:[%s931_s21 + $0x68] sm:$0xff] }
  0x40   : > { %v275_v19 = vmul.f32 %v523_v14, %v957_v17  ;;  %v538_v21 = vor.u32 %v537_v58, %v536_v11  ;;  %v276_v22 = vmul.f32 %v531_v16, %v957_v17  ;;  %vm1024_vm5 = vcmp.lt.f32.partialorder %v548_v8, 8388608.0 }
  0x41   : > { %v290_v24 = vadd.f32 %v274_v15, %v940_v2  ;;  %v546_v25 = vor.u32 %v545_v4, %v544_v18  ;;  %v551_v26 = vcvt.s32.f32 %v550_v12  ;;  %v231_v32 = vsub.f32 %v215_v39, %v940_v2 }
  0x42   : > { %v291_v29 = vadd.f32 %v275_v19, %v940_v2  ;;  %v539_v30 = vsel %vm1001_vm3, %v538_v21, %v244_v36  ;;  %v292_v31 = vadd.f32 %v276_v22, %v940_v2  ;;  %v247_v35 = vmul.f32 %v961_v20, %v230_v27 }
  0x43   : > { %v277_v33 = vmul.f32 %v539_v30, %v957_v17  ;;  %v547_v34 = vsel %vm1006_vm4, %v546_v25, %v982_v37  ;;  %v552_v40 = vand.u32 2147483647, %v551_v26  ;;  %v248_v36 = vmul.f32 %v961_v20, %v231_v32 }
  0x44   : > { %v464_v41 = vpack.c.bf16 %v291_v29, %v290_v24  ;;  %v278_v42 = vmul.f32 %v547_v34, %v957_v17  ;;  %v199_v43 = vmax.f32 %v940_v2, %v182_v28  ;;  %v556_v45 = vand.u32 2147483647, %v247_v35 }
  0x45   : > { %v293_v39 = vadd.f32 %v277_v33, %v940_v2  ;;  %v554_v44 = vor.u32 %v553_v13, %v552_v40  ;;  %v558_v46 = vcvt.f32.s32 %v247_v35  ;;  %v564_v47 = vand.u32 2147483647, %v248_v36 }
  0x46   : > { %465 = vst [vmem:[%s1046_s6] sm:$0xff] %v464_v41   ;;  %v294_v37 = vadd.f32 %v278_v42, %v940_v2  ;;  %v566_v48 = vcvt.f32.s32 %v248_v36  ;;  %v561_v54 = vand.u32 2147483648, %v247_v35  ;;  %vm1057_vm6 = vcmp.lt.f32.partialorder %v556_v45, 8388608.0 }
  0x47   : > { %v469_v51 = vpack.c.bf16 %v293_v39, %v292_v31  ;;  %v555_v52 = vsel %vm1024_vm5, %v554_v44, %v985_v38  ;;  %v559_v53 = vcvt.s32.f32 %v558_v46  ;;  %v569_v59 = vand.u32 2147483648, %v248_v36 }
  0x48   : > { %v279_v56 = vmul.f32 %v555_v52, %v957_v17  ;;  %v567_v58 = vcvt.s32.f32 %v566_v48  ;;  %v200_v61 = vmax.f32 %v940_v2, %v183_v49  ;;  %v216_v62 = vmin.f32 %v949_v10, %v199_v43 }
  0x49   : > { %501 = vst [vmem:[%s1046_s6 + $0x8] sm:$0xff] %v469_v51   ;;  %v560_v60 = vand.u32 2147483647, %v559_v53  ;;  %v201_v38 = vmax.f32 %v940_v2, %v184_v50  ;;  %vm1067_vm7 = vcmp.lt.f32.partialorder %v564_v47, 8388608.0  ;;  %v202_v4 = vmax.f32 %v940_v2, %v185_v55  ;;  %v188_v50 = vld [vmem:[%s931_s21 + $0x70] sm:$0xff] }
  0x4a   : > { %v295_v0 = vadd.f32 %v279_v56, %v940_v2  ;;  %v568_v3 = vand.u32 2147483647, %v567_v58  ;;  %v217_v6 = vmin.f32 %v949_v10, %v200_v61  ;;  %v232_v7 = vsub.f32 %v216_v62, %v940_v2 }
  0x4b   : > { %v562_v5 = vor.u32 %v561_v54, %v560_v60  ;;  %v218_v8 = vmin.f32 %v949_v10, %v201_v38  ;;  %v219_v13 = vmin.f32 %v949_v10, %v202_v4  ;;  %v203_v14 = vmax.f32 %v940_v2, %v186_v63 }
  0x4c   : > { %v474_v11 = vpack.c.bf16 %v295_v0, %v294_v37  ;;  %v570_v12 = vor.u32 %v569_v59, %v568_v3  ;;  %v233_v16 = vsub.f32 %v217_v6, %v940_v2  ;;  %v249_v18 = vmul.f32 %v961_v20, %v232_v7  ;;  %v189_v59 = vld [vmem:[%s931_s21 + $0x78] sm:$0xff]  ;;  %s761_s21 = scalar_lea.hbm %s760_s19, 64 }
  0x4d   : > { %v563_v15 = vsel %vm1057_vm6, %v562_v5, %v247_v35  ;;  %v234_v19 = vsub.f32 %v218_v8, %v940_v2  ;;  %v235_v23 = vsub.f32 %v219_v13, %v940_v2  ;;  %v204_v24 = vmax.f32 %v940_v2, %v187_v9  ;;  %p762_p3 = scmp.ne.s32.totalorder %s760_s19, %s761_s21  ;;  %p767_p7 = scmp.lt.s32.totalorder %s765_s28, %s761_s21 }
  0x4e   : > { %502 = vst [vmem:[%s1046_s6 + $0x10] sm:$0xff] %v474_v11   ;;  %v571_v21 = vsel %vm1067_vm7, %v570_v12, %v248_v36  ;;  %v280_v22 = vmul.f32 %v563_v15, %v957_v17  ;;  %v250_v26 = vmul.f32 %v961_v20, %v233_v16  ;;  %v572_v27 = vand.u32 2147483647, %v249_v18 }
  0x4f   : > { %v281_v25 = vmul.f32 %v571_v21, %v957_v17  ;;  %v574_v28 = vcvt.f32.s32 %v249_v18  ;;  %v577_v30 = vand.u32 2147483648, %v249_v18  ;;  %v251_v31 = vmul.f32 %v961_v20, %v234_v19  ;;  %p763_p4 = pnand %p762_p3, %p905_p9  ;;  %p768_p8 = por %p767_p7, %p766_p6 }
  0x50   : > { %v296_v29 = vadd.f32 %v280_v22, %v940_v2  ;;  %v220_v32 = vmin.f32 %v949_v10, %v203_v14  ;;  %v580_v40 = vand.u32 2147483647, %v250_v26  ;;  %v252_v35 = vmul.f32 %v961_v20, %v235_v23 }
  0x51   : > { %v297_v33 = vadd.f32 %v281_v25, %v940_v2  ;;  %v575_v34 = vcvt.s32.f32 %v574_v28  ;;  %vm1096_vm8 = vcmp.lt.f32.partialorder %v572_v27, 8388608.0  ;;  %v582_v42 = vcvt.f32.s32 %v250_v26  ;;  %p764_p5 = pneg %p763_p4 }
  0x52   : > { %v588_v36 = vand.u32 2147483647, %v251_v31  ;;  %v590_v43 = vcvt.f32.s32 %v251_v31  ;;  %vm1100_vm9 = vcmp.lt.f32.partialorder %v580_v40, 8388608.0  ;;  %v585_v46 = vand.u32 2147483648, %v250_v26 }
  0x53   : > { %v479_v39 = vpack.c.bf16 %v297_v33, %v296_v29  ;;  %v576_v44 = vand.u32 2147483647, %v575_v34  ;;  %v583_v37 = vcvt.s32.f32 %v582_v42  ;;  %v593_v49 = vand.u32 2147483648, %v251_v31  ;;  %p769_p10 = pnand %p768_p8, %p764_p5 }
  0x54   : > { %vm1104_vm10 = vcmp.lt.f32.partialorder %v588_v36, 8388608.0  ;;  %v591_v48 = vcvt.s32.f32 %v590_v43  ;;  %v596_v52 = vand.u32 2147483647, %v252_v35  ;;  %v598_v53 = vcvt.f32.s32 %v252_v35 }
  0x55   : > { %503 = vst [vmem:[%s1046_s6 + $0x18] sm:$0xff] %v479_v39   ;;  %v578_v51 = vor.u32 %v577_v30, %v576_v44  ;;  %v221_v54 = vmin.f32 %v949_v10, %v204_v24  ;;  %v584_v55 = vand.u32 2147483647, %v583_v37  ;;  %v601_v57 = vand.u32 2147483648, %v252_v35 }
  0x56   : > { %v592_v56 = vand.u32 2147483647, %v591_v48  ;;  %v236_v58 = vsub.f32 %v220_v32, %v940_v2  ;;  %v599_v61 = vcvt.s32.f32 %v598_v53  ;;  %v205_v38 = vmax.f32 %v940_v2, %v188_v50 }
  0x57   : > { %v579_v60 = vsel %vm1096_vm8, %v578_v51, %v249_v18  ;;  %v237_v62 = vsub.f32 %v221_v54, %v940_v2  ;;  %v586_v63 = vor.u32 %v585_v46, %v584_v55  ;;  %vm1119_vm11 = vcmp.lt.f32.partialorder %v596_v52, 8388608.0 }
  0x58   : > { %v282_v0 = vmul.f32 %v579_v60, %v957_v17  ;;  %v594_v1 = vor.u32 %v593_v49, %v592_v56  ;;  %v253_v3 = vmul.f32 %v961_v20, %v236_v58  ;;  %v600_v5 = vand.u32 2147483647, %v599_v61 }
  0x59   : > { %v254_v6 = vmul.f32 %v961_v20, %v237_v62  ;;  %v206_v7 = vmax.f32 %v940_v2, %v189_v59  ;;  %v587_v8 = vsel %vm1100_vm9, %v586_v63, %v250_v26  ;;  %v222_v12 = vmin.f32 %v949_v10, %v205_v38 }
  0x5a   : > { %v298_v9 = vadd.f32 %v282_v0, %v940_v2  ;;  %v595_v11 = vsel %vm1104_vm10, %v594_v1, %v251_v31  ;;  %v283_v13 = vmul.f32 %v587_v8, %v957_v17  ;;  %v602_v14 = vor.u32 %v601_v57, %v600_v5 }
  0x5b   : > { %v284_v15 = vmul.f32 %v595_v11, %v957_v17  ;;  %v606_v16 = vcvt.f32.s32 %v253_v3  ;;  %v604_v18 = vand.u32 2147483647, %v253_v3  ;;  %v609_v19 = vand.u32 2147483648, %v253_v3 }
  0x5c   : > { %v614_v21 = vcvt.f32.s32 %v254_v6  ;;  %v299_v22 = vadd.f32 %v283_v13, %v940_v2  ;;  %v603_v23 = vsel %vm1119_vm11, %v602_v14, %v252_v35  ;;  %v612_v25 = vand.u32 2147483647, %v254_v6 }
  0x5d   : > { %v607_v24 = vcvt.s32.f32 %v606_v16  ;;  %v285_v26 = vmul.f32 %v603_v23, %v957_v17  ;;  %v300_v27 = vadd.f32 %v284_v15, %v940_v2  ;;  %v617_v29 = vand.u32 2147483648, %v254_v6 }
  0x5e   : > { %v615_v28 = vcvt.s32.f32 %v614_v21  ;;  %v484_v30 = vpack.c.bf16 %v299_v22, %v298_v9  ;;  %v223_v32 = vmin.f32 %v949_v10, %v206_v7  ;;  %v238_v33 = vsub.f32 %v222_v12, %v940_v2 }
  0x5f   : > { %v608_v31 = vand.u32 2147483647, %v607_v24  ;;  %v301_v34 = vadd.f32 %v285_v26, %v940_v2  ;;  %vm605_vm12 = vcmp.lt.f32.partialorder %v604_v18, 8388608.0  ;;  %vm613_vm13 = vcmp.lt.f32.partialorder %v612_v25, 8388608.0 }
  0x60   : > { %v616_v40 = vand.u32 2147483647, %v615_v28  ;;  %504 = vst [vmem:[%s1046_s6 + $0x20] sm:$0xff] %v484_v30   ;;  %v239_v41 = vsub.f32 %v223_v32, %v940_v2  ;;  %v255_v42 = vmul.f32 %v961_v20, %v238_v33 }
  0x61   : > { %v610_v35 = vor.u32 %v609_v19, %v608_v31  ;;  %v489_v36 = vpack.c.bf16 %v301_v34, %v300_v27 }
  0x62   : > { %v618_v43 = vor.u32 %v617_v29, %v616_v40  ;;  %v256_v44 = vmul.f32 %v961_v20, %v239_v41  ;;  %v622_v45 = vcvt.f32.s32 %v255_v42  ;;  %v620_v37 = vand.u32 2147483647, %v255_v42 }
  0x63   : > { %v611_v39 = vsel %vm605_vm12, %v610_v35, %v253_v3  ;;  %505 = vst [vmem:[%s1046_s6 + $0x28] sm:$0xff] %v489_v36   ;;  %v625_v49 = vand.u32 2147483648, %v255_v42 }
  0x64   : > { %v619_v10 = vsel %vm613_vm13, %v618_v43, %v254_v6  ;;  %v286_v46 = vmul.f32 %v611_v39, %v957_v17  ;;  %v623_v48 = vcvt.s32.f32 %v622_v45  ;;  %v630_v51 = vcvt.f32.s32 %v256_v44 }
  0x65   : > { %v287_v47 = vmul.f32 %v619_v10, %v957_v17  ;;  %v628_v20 = vand.u32 2147483647, %v256_v44  ;;  %vm621_vm14 = vcmp.lt.f32.partialorder %v620_v37, 8388608.0  ;;  %v633_v55 = vand.u32 2147483648, %v256_v44 }
  0x66   : > { %v302_v50 = vadd.f32 %v286_v46, %v940_v2  ;;  %v624_v53 = vand.u32 2147483647, %v623_v48  ;;  %v631_v54 = vcvt.s32.f32 %v630_v51 }
  0x67   : > { %v303_v52 = vadd.f32 %v287_v47, %v940_v2  ;;  %vm629_vm15 = vcmp.lt.f32.partialorder %v628_v20, 8388608.0 }
  0x68   : > { %v626_v57 = vor.u32 %v625_v49, %v624_v53  ;;  %v632_v58 = vand.u32 2147483647, %v631_v54 }
  0x69   : > { %v494_v56 = vpack.c.bf16 %v303_v52, %v302_v50 }
  0x6a   : > { %v627_v59 = vsel %vm621_vm14, %v626_v57, %v255_v42  ;;  %v634_v60 = vor.u32 %v633_v55, %v632_v58 }
  0x6b   : > { %506 = vst [vmem:[%s1046_s6 + $0x30] sm:$0xff] %v494_v56   ;;  %v288_v61 = vmul.f32 %v627_v59, %v957_v17 }
  0x6c   : > { %v635_v62 = vsel %vm629_vm15, %v634_v60, %v256_v44 }
  0x6d   : > { %v289_v38 = vmul.f32 %v635_v62, %v957_v17  ;;  %v304_v63 = vadd.f32 %v288_v61, %v940_v2 }
  0x6f   : > { %v305_v0 = vadd.f32 %v289_v38, %v940_v2 }
  0x71   : > { %v499_v1 = vpack.c.bf16 %v305_v0, %v304_v63 }
  0x73   : > { %507 = vst [vmem:[%s1046_s6 + $0x38] sm:$0xff] %v499_v1  }
  0x74   : > { %772 = shalt.err (!%p769_p10)
}
  0x75   : > { %s834_s12 = smov 64   ;;  %s835_s3 = smov 4  }
  0x76   : > { %638 = dma.vmem_to_hbm [thread:$0]  (%p905_p9), %s354_s11, 1024, %s356_s16, %s339_s18, %s834_s12, %s834_s12, %s835_s3  }
  0x77 PF: > { %p649_p12 = scmp.ge.s32.totalorder %s829_s0, 2  ;;  %s370_s4 = sand.u32 1, %s809_s13  }
  0x78   : > { %s371_s5 = scalar_lea.sflag [#allocation6], %s370_s4 }
  0x79   : > { %p645_p13 = pnand %p649_p12, %p912_p11 }
  0x7b   : > { %p646_p0 = pneg %p645_p13 }
  0x7d   : > { %804 = dma.done.wait (%p646_p0), %s371_s5, 1024  }
  0x7e   : > { %806 = vsyncadd (%p646_p0), %s371_s5, 4294966272  ;;  %s26_s0 = sadd.s32 1, %s829_s0   ;;  %s1225_s13 = smov %s813_s14 }
  0x7f   : > { %p23_p1 = scmp.ge.s32.totalorder %s26_s0, 5   ;;  %s1226_s14 = smov %s817_s15 }
  0x80   : > { %s1227_s15 = smov %s910_s26  ;;  %s1228_s16 = smov %s825_s17 }
  0x81   : > { %s1229_s17 = smov %s1231_s20  ;;  %25 = sbr.rel (!%p23_p1) target bundleno = 12 (0xc), region = 69 }
  0x86   :  { %377 = vsyncpa [#allocation5], 1 }
  0x87   :  { %379 = vsyncpa [#allocation5 + $0x1], 1 }
  0x88   :  { %380 = vsyncpa [#allocation6], 1 }
  0x89   :  { %382 = vsyncpa [#allocation6 + $0x1], 1 }

</bundles_post_ra>
